<compile_context>
chip_gen: v5e
topology: v5e:2x2
jax: 0.10.0
libtpu: 0.0.40
codegen_flags: <defaults>
</compile_context>

<pallas_src>
import jax
import jax.numpy as jnp
from jax.experimental import pallas as pl
from jax.experimental.pallas import tpu as pltpu


_LANE = 128


def _detected_vmem_bytes():
    try:
        return int(pltpu.get_tpu_info().vmem_capacity_bytes)
    except Exception:
        return 64 << 20  # conservative (v7x-class) fallback


def _make_kernel(tb, ts, n_true, s_grid):
    """Kernel body; tb images per batch block, ts spatial columns per step."""
    rows = 3 * tb
    inv_n = 1.0 / float(n_true)
    tail = n_true - (s_grid - 1) * ts      # valid columns in the last tile
    need_mask = tail != ts                 # static

    def kernel(x_ref, ori_ref, out_ref, acc_x, acc_o):
        s = pl.program_id(1)

        @pl.when(s == 0)
        def _init():
            acc_x[...] = jnp.zeros_like(acc_x)
            acc_o[...] = jnp.zeros_like(acc_o)

        def accumulate(xv, ov):
            # Pre-scale each tile's partial sum by 1/(H*W) -> accumulates means.
            acc_x[...] += jnp.sum(xv, axis=-1, keepdims=True) * inv_n
            acc_o[...] += jnp.sum(ov, axis=-1, keepdims=True) * inv_n

        if need_mask:
            @pl.when(s < s_grid - 1)
            def _full_tile():
                accumulate(x_ref[...].astype(jnp.float32),
                           ori_ref[...].astype(jnp.float32))

            @pl.when(s == s_grid - 1)
            def _ragged_tile():
                col = jax.lax.broadcasted_iota(jnp.int32, (rows, ts), 1)
                valid = col < tail
                xv = jnp.where(valid, x_ref[...].astype(jnp.float32), 0.0)
                ov = jnp.where(valid, ori_ref[...].astype(jnp.float32), 0.0)
                accumulate(xv, ov)
        else:
            accumulate(x_ref[...].astype(jnp.float32),
                       ori_ref[...].astype(jnp.float32))

        @pl.when(s == s_grid - 1)
        def _finalize():
            # Rows are channel-interleaved: image i -> rows 3i (R), 3i+1 (G),
            # 3i+2 (B).  tb <= 8, so this epilogue is a handful of (1,1) ops.
            row_iota = jax.lax.broadcasted_iota(jnp.int32, (tb, 1), 0)
            k_vec = jnp.zeros((tb, 1), jnp.float32)
            for i in range(tb):
                mr = acc_x[pl.ds(3 * i, 1), :]
                mg = acc_x[pl.ds(3 * i + 1, 1), :]
                mb = acc_x[pl.ds(3 * i + 2, 1), :]
                omr = acc_o[pl.ds(3 * i, 1), :]
                omg = acc_o[pl.ds(3 * i + 1, 1), :]
                omb = acc_o[pl.ds(3 * i + 2, 1), :]
                drg = (mr / mg - omr / omg) ** 2
                drb = (mr / mb - omr / omb) ** 2
                dgb = (mb / mg - omb / omg) ** 2
                k_vec = jnp.where(row_iota == i, drg + drb + dgb, k_vec)
            out_ref[...] = k_vec.astype(out_ref.dtype)

    return kernel


def l_color_ratio(x, ori, *, block_budget_bytes=None):
    """Pallas TPU implementation of L_color_ratio.forward.

    x, ori: (B, 3, H, W).  Returns (B, 1, 1, 1) float32 (torch keepdim
    semantics of the reference module).
    """
    b, c, h, w = x.shape
    assert c == 3, "L_color_ratio expects 3 channels (RGB)"
    assert ori.shape == x.shape
    n = h * w

    vmem_bytes = _detected_vmem_bytes()
    if block_budget_bytes is None:
        # ~12 MiB/input block on 128 MiB-VMEM parts, ~5 MiB on 64 MiB parts.
        block_budget_bytes = (12 << 20) if vmem_bytes >= (100 << 20) else (5 << 20)

    # Lane-dense 2D views (free reshapes, native dtype; the kernel casts).
    x2 = jnp.reshape(x, (b * 3, n))
    o2 = jnp.reshape(ori, (b * 3, n))
    itemsize = max(jnp.dtype(x2.dtype).itemsize, jnp.dtype(o2.dtype).itemsize)

    # Images per batch block: the full batch when b <= 8 (rows == full dim is
    # exempt from the 8-sublane rule), otherwise 8 (rows = 24, multiple of 8).
    # The cap also keeps the in-kernel finalize epilogue tiny.
    tb = b if b <= 8 else 8
    rows = 3 * tb
    gb = -(-b // tb)

    # Spatial tile: the full H*W if it fits the per-input block budget
    # (exempt from the 128-lane rule), else the largest 128-multiple that fits.
    max_ts = max(_LANE, block_budget_bytes // (rows * itemsize))
    if n <= max_ts:
        ts = n
    else:
        ts = max(_LANE, (max_ts // _LANE) * _LANE)
    s_grid = -(-n // ts)

    # Honest VMEM accounting: padded tile footprints x 2 pipeline buffers.
    def _blk_bytes(dt):
        isz = jnp.dtype(dt).itemsize
        sub = 8 if isz >= 4 else (16 if isz == 2 else 32)
        rows_pad = -(-rows // sub) * sub
        ts_pad = -(-ts // _LANE) * _LANE
        return rows_pad * ts_pad * isz

    acc_pad = (-(-rows // 8) * 8) * _LANE * 4
    out_pad = (-(-tb // 8) * 8) * _LANE * 4
    vmem_needed = (2 * (_blk_bytes(x2.dtype) + _blk_bytes(o2.dtype))
                   + 2 * acc_pad + 2 * out_pad + (4 << 20))
    vmem_limit = int(min(max(vmem_needed, 24 << 20),
                         max(32 << 20, vmem_bytes - (16 << 20))))

    kernel = _make_kernel(tb, ts, n, s_grid)

    out = pl.pallas_call(
        kernel,
        out_shape=jax.ShapeDtypeStruct((gb * tb, 1), jnp.float32),
        grid_spec=pltpu.PrefetchScalarGridSpec(
            num_scalar_prefetch=0,
            grid=(gb, s_grid),
            in_specs=[
                pl.BlockSpec((rows, ts), lambda i, s: (i, s)),
                pl.BlockSpec((rows, ts), lambda i, s: (i, s)),
            ],
            out_specs=pl.BlockSpec((tb, 1), lambda i, s: (i, 0)),
            scratch_shapes=[
                pltpu.VMEM((rows, 1), jnp.float32),   # running mean of x
                pltpu.VMEM((rows, 1), jnp.float32),   # running mean of ori
            ],
        ),
        compiler_params=pltpu.CompilerParams(
            dimension_semantics=("parallel", "arbitrary"),
            vmem_limit_bytes=vmem_limit,
        ),
    )(x2, o2)

    # TODO(synk): on v7x with gb == 1 both TensorCores could be used by
    # splitting the spatial reduction into two parallel partial sums combined
    # wrapper-side; skipped here to keep the full epilogue in-kernel.
    return out[:b].reshape(b, 1, 1, 1)


def _reference(x, ori):
    m = jnp.mean(x.astype(jnp.float32), axis=(2, 3), keepdims=True)
    om = jnp.mean(ori.astype(jnp.float32), axis=(2, 3), keepdims=True)
    mr, mg, mb = m[:, 0:1], m[:, 1:2], m[:, 2:3]
    omr, omg, omb = om[:, 0:1], om[:, 1:2], om[:, 2:3]
    drg = (mr / mg - omr / omg) ** 2
    drb = (mr / mb - omr / omb) ** 2
    dgb = (mb / mg - omb / omg) ** 2
    return drg + drb + dgb


if __name__ == "__main__":
    key = jax.random.PRNGKey(0)
    k1, k2, k3, k4, k5, k6 = jax.random.split(key, 6)
    C = 3

    # --- Test 1: small images, whole problem in one block (grid (1,1)). ---
    B, H, W = 2, 16, 16
    x = jax.random.uniform(k1, (B, C, H, W), jnp.float32, minval=0.1, maxval=1.0)
    ori = jax.random.uniform(k2, (B, C, H, W), jnp.float32, minval=0.1, maxval=1.0)
    out = jax.block_until_ready(l_color_ratio(x, ori))
    ref = _reference(x, ori)
    assert out.shape == (B, 1, 1, 1)
    assert jnp.allclose(out, ref, rtol=2e-5, atol=1e-5)

    # --- Test 2: force the spatially-tiled accumulator path with a ragged
    #     tail (H*W = 576 split into 256/256/64, in-kernel masking). ---
    B2, H2, W2 = 3, 24, 24
    x2 = jax.random.uniform(k3, (B2, C, H2, W2), jnp.float32, minval=0.1, maxval=1.0)
    o2 = jax.random.uniform(k4, (B2, C, H2, W2), jnp.float32, minval=0.1, maxval=1.0)
    out2 = jax.block_until_ready(
        l_color_ratio(x2, o2, block_budget_bytes=3 * B2 * 256 * 4))
    ref2 = _reference(x2, o2)
    assert out2.shape == (B2, 1, 1, 1)
    assert jnp.allclose(out2, ref2, rtol=2e-5, atol=1e-5)

    # --- Test 3: batch not divisible by the batch tile (edge batch block,
    #     garbage rows sliced off wrapper-side, no padding anywhere). ---
    B3, H3, W3 = 10, 16, 16
    x3 = jax.random.uniform(k5, (B3, C, H3, W3), jnp.float32, minval=0.1, maxval=1.0)
    o3 = jax.random.uniform(k6, (B3, C, H3, W3), jnp.float32, minval=0.1, maxval=1.0)
    out3 = jax.block_until_ready(l_color_ratio(x3, o3))
    ref3 = _reference(x3, o3)
    assert out3.shape == (B3, 1, 1, 1)
    assert jnp.allclose(out3, ref3, rtol=2e-5, atol=1e-5)

    print("KERNEL_OK")
</pallas_src>

<mosaic_0001>
module attributes {stable_mosaic.version = 11 : i64} {
  func.func @kernel(%arg0: i32, %arg1: i32, %arg2: memref<6x256xf32, #tpu.memory_space<vmem>>, %arg3: memref<6x256xf32, #tpu.memory_space<vmem>>, %arg4: memref<2x1xf32, #tpu.memory_space<vmem>>, %arg5: memref<6x1xf32, #tpu.memory_space<vmem>>, %arg6: memref<6x1xf32, #tpu.memory_space<vmem>>) attributes {dimension_semantics = [#tpu.dimension_semantics<parallel>, #tpu.dimension_semantics<arbitrary>], iteration_bounds = array<i64: 1, 1>, scalar_prefetch = 0 : i64, scratch_operands = 2 : i64, tpu.core_type = #tpu.core_type<tc>, window_params = [{transform_indices = @transform_0, window_bounds = array<i64: 6, 256>}, {transform_indices = @transform_1, window_bounds = array<i64: 6, 256>}, {transform_indices = @transform_2, window_bounds = array<i64: 2, 1>}]} {
    %c0_i32 = arith.constant 0 : i32
    %0 = arith.cmpi eq, %arg1, %c0_i32 : i32
    %1 = arith.extui %0 : i1 to i32
    %c0_i32_0 = arith.constant 0 : i32
    %2 = arith.cmpi ne, %1, %c0_i32_0 : i32
    scf.if %2 {
      %cst_17 = arith.constant 0.000000e+00 : f32
      %22 = vector.broadcast %cst_17 : f32 to vector<6x1xf32>
      %c0_18 = arith.constant 0 : index
      %c0_19 = arith.constant 0 : index
      %23 = vector.load %arg5[%c0_18, %c0_19] : memref<6x1xf32, #tpu.memory_space<vmem>>, vector<6x1xf32>
      tpu.vector_store %arg5[%c0_18, %c0_19], %22 {strides = array<i32>} : memref<6x1xf32, #tpu.memory_space<vmem>>, vector<6x1xf32>,
      %cst_20 = arith.constant 0.000000e+00 : f32
      %24 = vector.broadcast %cst_20 : f32 to vector<6x1xf32>
      %c0_21 = arith.constant 0 : index
      %c0_22 = arith.constant 0 : index
      %25 = vector.load %arg6[%c0_21, %c0_22] : memref<6x1xf32, #tpu.memory_space<vmem>>, vector<6x1xf32>
      tpu.vector_store %arg6[%c0_21, %c0_22], %24 {strides = array<i32>} : memref<6x1xf32, #tpu.memory_space<vmem>>, vector<6x1xf32>,
    } else {
    }
    %c0 = arith.constant 0 : index
    %c0_1 = arith.constant 0 : index
    %3 = vector.load %arg2[%c0, %c0_1] : memref<6x256xf32, #tpu.memory_space<vmem>>, vector<6x256xf32>
    %c0_2 = arith.constant 0 : index
    %c0_3 = arith.constant 0 : index
    %4 = vector.load %arg3[%c0_2, %c0_3] : memref<6x256xf32, #tpu.memory_space<vmem>>, vector<6x256xf32>
    %c0_4 = arith.constant 0 : index
    %c0_5 = arith.constant 0 : index
    %5 = vector.load %arg5[%c0_4, %c0_5] : memref<6x1xf32, #tpu.memory_space<vmem>>, vector<6x1xf32>
    %cst = arith.constant dense<0.000000e+00> : vector<6xf32>
    %6 = vector.multi_reduction <add>, %3, %cst [1] : vector<6x256xf32> to vector<6xf32>
    %7 = vector.shape_cast %6 : vector<6xf32> to vector<6x1xf32>
    %cst_6 = arith.constant 3.906250e-03 : f32
    %8 = vector.broadcast %cst_6 : f32 to vector<6x1xf32>
    %9 = arith.mulf %7, %8 : vector<6x1xf32>
    %10 = arith.addf %5, %9 : vector<6x1xf32>
    %c0_7 = arith.constant 0 : index
    %c0_8 = arith.constant 0 : index
    %11 = vector.load %arg5[%c0_7, %c0_8] : memref<6x1xf32, #tpu.memory_space<vmem>>, vector<6x1xf32>
    tpu.vector_store %arg5[%c0_7, %c0_8], %10 {strides = array<i32>} : memref<6x1xf32, #tpu.memory_space<vmem>>, vector<6x1xf32>,
    %c0_9 = arith.constant 0 : index
    %c0_10 = arith.constant 0 : index
    %12 = vector.load %arg6[%c0_9, %c0_10] : memref<6x1xf32, #tpu.memory_space<vmem>>, vector<6x1xf32>
    %cst_11 = arith.constant dense<0.000000e+00> : vector<6xf32>
    %13 = vector.multi_reduction <add>, %4, %cst_11 [1] : vector<6x256xf32> to vector<6xf32>
    %14 = vector.shape_cast %13 : vector<6xf32> to vector<6x1xf32>
    %cst_12 = arith.constant 3.906250e-03 : f32
    %15 = vector.broadcast %cst_12 : f32 to vector<6x1xf32>
    %16 = arith.mulf %14, %15 : vector<6x1xf32>
    %17 = arith.addf %12, %16 : vector<6x1xf32>
    %c0_13 = arith.constant 0 : index
    %c0_14 = arith.constant 0 : index
    %18 = vector.load %arg6[%c0_13, %c0_14] : memref<6x1xf32, #tpu.memory_space<vmem>>, vector<6x1xf32>
    tpu.vector_store %arg6[%c0_13, %c0_14], %17 {strides = array<i32>} : memref<6x1xf32, #tpu.memory_space<vmem>>, vector<6x1xf32>,
    %c0_i32_15 = arith.constant 0 : i32
    %19 = arith.cmpi eq, %arg1, %c0_i32_15 : i32
    %20 = arith.extui %19 : i1 to i32
    %c0_i32_16 = arith.constant 0 : i32
    %21 = arith.cmpi ne, %20, %c0_i32_16 : i32
    scf.if %21 {
      %22 = tpu.iota {dimensions = array<i32: 0>} : vector<2x1xi32>
      %cst_17 = arith.constant 0.000000e+00 : f32
      %23 = vector.broadcast %cst_17 : f32 to vector<2x1xf32>
      %c0_18 = arith.constant 0 : index
      %c0_19 = arith.constant 0 : index
      %24 = vector.load %arg5[%c0_18, %c0_19] : memref<6x1xf32, #tpu.memory_space<vmem>>, vector<1x1xf32>
      %c1 = arith.constant 1 : index
      %c0_20 = arith.constant 0 : index
      %25 = vector.load %arg5[%c1, %c0_20] : memref<6x1xf32, #tpu.memory_space<vmem>>, vector<1x1xf32>
      %c2 = arith.constant 2 : index
      %c0_21 = arith.constant 0 : index
      %26 = vector.load %arg5[%c2, %c0_21] : memref<6x1xf32, #tpu.memory_space<vmem>>, vector<1x1xf32>
      %c0_22 = arith.constant 0 : index
      %c0_23 = arith.constant 0 : index
      %27 = vector.load %arg6[%c0_22, %c0_23] : memref<6x1xf32, #tpu.memory_space<vmem>>, vector<1x1xf32>
      %c1_24 = arith.constant 1 : index
      %c0_25 = arith.constant 0 : index
      %28 = vector.load %arg6[%c1_24, %c0_25] : memref<6x1xf32, #tpu.memory_space<vmem>>, vector<1x1xf32>
      %c2_26 = arith.constant 2 : index
      %c0_27 = arith.constant 0 : index
      %29 = vector.load %arg6[%c2_26, %c0_27] : memref<6x1xf32, #tpu.memory_space<vmem>>, vector<1x1xf32>
      %30 = arith.divf %24, %25 : vector<1x1xf32>
      %31 = arith.divf %27, %28 : vector<1x1xf32>
      %32 = arith.subf %30, %31 : vector<1x1xf32>
      %33 = arith.mulf %32, %32 : vector<1x1xf32>
      %34 = arith.divf %24, %26 : vector<1x1xf32>
      %35 = arith.divf %27, %29 : vector<1x1xf32>
      %36 = arith.subf %34, %35 : vector<1x1xf32>
      %37 = arith.mulf %36, %36 : vector<1x1xf32>
      %38 = arith.divf %26, %25 : vector<1x1xf32>
      %39 = arith.divf %29, %28 : vector<1x1xf32>
      %40 = arith.subf %38, %39 : vector<1x1xf32>
      %41 = arith.mulf %40, %40 : vector<1x1xf32>
      %c0_i32_28 = arith.constant 0 : i32
      %42 = vector.broadcast %c0_i32_28 : i32 to vector<2x1xi32>
      %43 = arith.cmpi eq, %22, %42 : vector<2x1xi32>
      %44 = arith.addf %33, %37 : vector<1x1xf32>
      %45 = arith.addf %44, %41 : vector<1x1xf32>
      %46 = vector.shape_cast %45 : vector<1x1xf32> to vector<1x1xf32>
      %47 = vector.broadcast %46 : vector<1x1xf32> to vector<2x1xf32>
      %48 = arith.select %43, %47, %23 : vector<2x1xi1>, vector<2x1xf32>
      %c3 = arith.constant 3 : index
      %c0_29 = arith.constant 0 : index
      %49 = vector.load %arg5[%c3, %c0_29] : memref<6x1xf32, #tpu.memory_space<vmem>>, vector<1x1xf32>
      %c4 = arith.constant 4 : index
      %c0_30 = arith.constant 0 : index
      %50 = vector.load %arg5[%c4, %c0_30] : memref<6x1xf32, #tpu.memory_space<vmem>>, vector<1x1xf32>
      %c5 = arith.constant 5 : index
      %c0_31 = arith.constant 0 : index
      %51 = vector.load %arg5[%c5, %c0_31] : memref<6x1xf32, #tpu.memory_space<vmem>>, vector<1x1xf32>
      %c3_32 = arith.constant 3 : index
      %c0_33 = arith.constant 0 : index
      %52 = vector.load %arg6[%c3_32, %c0_33] : memref<6x1xf32, #tpu.memory_space<vmem>>, vector<1x1xf32>
      %c4_34 = arith.constant 4 : index
      %c0_35 = arith.constant 0 : index
      %53 = vector.load %arg6[%c4_34, %c0_35] : memref<6x1xf32, #tpu.memory_space<vmem>>, vector<1x1xf32>
      %c5_36 = arith.constant 5 : index
      %c0_37 = arith.constant 0 : index
      %54 = vector.load %arg6[%c5_36, %c0_37] : memref<6x1xf32, #tpu.memory_space<vmem>>, vector<1x1xf32>
      %55 = arith.divf %49, %50 : vector<1x1xf32>
      %56 = arith.divf %52, %53 : vector<1x1xf32>
      %57 = arith.subf %55, %56 : vector<1x1xf32>
      %58 = arith.mulf %57, %57 : vector<1x1xf32>
      %59 = arith.divf %49, %51 : vector<1x1xf32>
      %60 = arith.divf %52, %54 : vector<1x1xf32>
      %61 = arith.subf %59, %60 : vector<1x1xf32>
      %62 = arith.mulf %61, %61 : vector<1x1xf32>
      %63 = arith.divf %51, %50 : vector<1x1xf32>
      %64 = arith.divf %54, %53 : vector<1x1xf32>
      %65 = arith.subf %63, %64 : vector<1x1xf32>
      %66 = arith.mulf %65, %65 : vector<1x1xf32>
      %c1_i32 = arith.constant 1 : i32
      %67 = vector.broadcast %c1_i32 : i32 to vector<2x1xi32>
      %68 = arith.cmpi eq, %22, %67 : vector<2x1xi32>
      %69 = arith.addf %58, %62 : vector<1x1xf32>
      %70 = arith.addf %69, %66 : vector<1x1xf32>
      %71 = vector.shape_cast %70 : vector<1x1xf32> to vector<1x1xf32>
      %72 = vector.broadcast %71 : vector<1x1xf32> to vector<2x1xf32>
      %73 = arith.select %68, %72, %48 : vector<2x1xi1>, vector<2x1xf32>
      %c0_38 = arith.constant 0 : index
      %c0_39 = arith.constant 0 : index
      %74 = vector.load %arg4[%c0_38, %c0_39] : memref<2x1xf32, #tpu.memory_space<vmem>>, vector<2x1xf32>
      tpu.vector_store %arg4[%c0_38, %c0_39], %73 {strides = array<i32>} : memref<2x1xf32, #tpu.memory_space<vmem>>, vector<2x1xf32>,
    } else {
    }
    return
  }
  func.func @transform_0(%arg0: i32, %arg1: i32) -> (i32, i32) {
    %c0_i32 = arith.constant 0 : i32
    return %arg0, %arg1 : i32, i32
  }
  func.func @transform_1(%arg0: i32, %arg1: i32) -> (i32, i32) {
    %c0_i32 = arith.constant 0 : i32
    return %arg0, %arg1 : i32, i32
  }
  func.func @transform_2(%arg0: i32, %arg1: i32) -> (i32, i32) {
    %c0_i32 = arith.constant 0 : i32
    %c0_i32_0 = arith.constant 0 : i32
    return %arg0, %c0_i32 : i32, i32
  }
}

</mosaic_0001>

<bundles_post_ra>
// kernel: tpu_custom_call.1
= control target key start
LH: loop header
LB: loop body
LE: loop exit
PB: predicated region body
PF: predicated region fallthrough
CT: control target
= control target key end

     0   :  { %7 = vsyncpa [#allocation5], 0  ;;  %s497_s0 = inlined_call_operand.hbm [shape: f32[6,256], index: 0, kind: input, shape index: {}]   ;;  %s498_s1 = inlined_call_operand.hbm [shape: f32[6,256], index: 1, kind: input, shape index: {}]   ;;  %s499_s2 = inlined_call_operand.vmem [shape: f32[2,1], index: 2, kind: output, shape index: {}]  }
   0x1   :  { %s14_s11 = sshll.u32 %s497_s0, 4  ;;  %s15_s11 = int_to_ptr.hbm [resolvable:$true] %s14_s11 }
   0x2   :  { %8 = vsyncpa [#allocation7], 0  ;;  %s312_s12 = smov [#allocation4]   ;;  %s25_s16 = sshll.u32 %s498_s1, 4  ;;  %s26_s16 = int_to_ptr.hbm [resolvable:$true] %s25_s16 }
   0x3   :  { %s16_s13 = sshll.u32 %s312_s12, 4  ;;  %s313_s17 = smov [#allocation6]   ;;  %s17_s13 = int_to_ptr.vmem [resolvable:$true] %s16_s13 }
   0x4   :  { %19 = dma.hbm_to_vmem [thread:$0]  %s15_s11, 256, %s17_s13, [#allocation5]  }
   0x5   :  { %s27_s18 = sshll.u32 %s313_s17, 4  ;;  %s28_s18 = int_to_ptr.vmem [resolvable:$true] %s27_s18 }
   0x6   :  { %30 = dma.hbm_to_vmem [thread:$0]  %s26_s16, 256, %s28_s18, [#allocation7]  }
   0x7   :  { %308 = dma.done.wait [#allocation5], 256  }
   0x8   :  { %309 = vsyncadd [#allocation5], 4294967040 }
   0x9   :  { %310 = dma.done.wait [#allocation7], 256  }
   0xa   :  { %311 = vsyncadd [#allocation7], 4294967040  ;;  %vm43_vm0 = vcmask 5120   ;;  %v314_v0 = vmov 0.0   ;;  %vm51_vm1 = vcmask 1045504  }
   0xb   :  { %44 = vst.msk [vmem:[#allocation2] sm:$0x3f] %vm43_vm0, %v314_v0  ;;  %v46_v1 = vld [vmem:[#allocation4] sm:$0x3f]  ;;  %v47_v2 = vld [vmem:[#allocation4 + $0x8] sm:$0x3f] }
   0xc   :  { %45 = vst.msk [vmem:[#allocation3] sm:$0x3f] %vm43_vm0, %v314_v0  ;;  %v52_v3 = vsel %vm51_vm1, %v46_v1, 0.0  ;;  %v53_v4 = vsel %vm51_vm1, %v47_v2, 0.0  ;;  %v48_v6 = vld [vmem:[#allocation6] sm:$0x3f] }
   0xd   :  { %v54_v5 = vadd.f32 %v53_v4, %v52_v3  ;;  %v49_v7 = vld [vmem:[#allocation6 + $0x8] sm:$0x3f]  ;;  %v62_v8 = vsel %vm51_vm1, %v48_v6, 0.0 }
   0xe   :  { %v63_v9 = vsel %vm51_vm1, %v49_v7, 0.0 }
   0xf   :  { %55 = vadd.xlane.f32.xlu0 %v54_v5  ;;  %v64_v10 = vadd.f32 %v63_v9, %v62_v8 }
  0x12   :  { %v50_v12 = vld [vmem:[#allocation2] sm:$0x3f] }
  0x13   :  { %v61_v16 = vld [vmem:[#allocation3] sm:$0x3f] }
  0x17   :  { %65 = vadd.xlane.f32.xlu0 %v64_v10 }
  0x82   :  { %v56_v11 = vpop.xlane.xlu0 %55 }
  0x83   :  { %v57_v13 = vmul.f32 0.00390625, %v56_v11 }
  0x85   :  { %v58_v14 = vadd.f32 %v57_v13, %v50_v12 }
  0x87   :  { %60 = vst.msk [vmem:[#allocation2] sm:$0x3f] %vm43_vm0, %v58_v14 }
  0x8a   :  { %v66_v15 = vpop.xlane.xlu0 %65 }
  0x8b   :  { %v67_v17 = vmul.f32 0.00390625, %v66_v15 }
  0x8d   :  { %v68_v18 = vadd.f32 %v67_v17, %v61_v16 }
  0x8e   :  { %v76_v19 = vld [vmem:[#allocation2 + $0x1] sm:$0x1]  ;;  %v339_v20 = vld [vmem:[#allocation2 + $0x2] sm:$0x1]  ;;  %v342_v21 = vld [vmem:[#allocation2 + $0x4] sm:$0x1] }
  0x8f   :  { %244 = vrcp.f32 %v76_v19  ;;  %69 = vst.msk [vmem:[#allocation3] sm:$0x3f] %vm43_vm0, %v68_v18  ;;  %v346_v22 = vld [vmem:[#allocation2 + $0x5] sm:$0x1]  ;;  %v92_v31 = vand.u32 2147483648, %v76_v19  ;;  %v124_v37 = vand.u32 2147483648, %v339_v20  ;;  %vm86_vm2 = vweird.f32 %v76_v19 }
  0x90   :  { %246 = vrcp.f32 %v339_v20  ;;  %v90_v34 = vand.u32 2147483647, %v76_v19  ;;  %v122_v36 = vand.u32 2147483647, %v339_v20  ;;  %v171_v41 = vand.u32 2147483648, %v342_v21 }
  0x91   :  { %248 = vrcp.f32 %v342_v21  ;;  %v93_v42 = vor.u32 1.1754944e-38, %v92_v31  ;;  %vm118_vm3 = vweird.f32 %v339_v20  ;;  %vm165_vm5 = vweird.f32 %v342_v21  ;;  %v154_v62 = vld [vmem:[#allocation2 + $0x3] sm:$0x1] }
  0x92   :  { %250 = vrcp.f32 %v346_v22  ;;  %vm376_vm4 = vcmp.eq.f32.partialorder %v90_v34, 8.507059e+37  ;;  %vm385_vm6 = vcmp.eq.f32.partialorder %v122_v36, 8.507059e+37  ;;  %v125_v49 = vor.u32 1.1754944e-38, %v124_v37 }
  0x93   :  { %v169_v50 = vand.u32 2147483647, %v342_v21  ;;  %v203_v51 = vand.u32 2147483648, %v346_v22  ;;  %v395_v55 = vor.u32 1.1754944e-38, %v171_v41  ;;  %vm197_vm1 = vweird.f32 %v346_v22 }
  0x95   :  { %v348_v23 = vpop.eup %244 }
  0x96   :  { %v351_v24 = vpop.eup %246  ;;  %v82_v25 = vmul.f32 %v348_v23, %v76_v19  ;;  %v360_v30 = vld [vmem:[#allocation3 + $0x1] sm:$0x1]  ;;  %v362_v33 = vld [vmem:[#allocation3 + $0x2] sm:$0x1]  ;;  %v370_v38 = vld [vmem:[#allocation3 + $0x4] sm:$0x1]  ;;  %vm87_vm7 = vweird.f32 %v348_v23 }
  0x97   :  { %v354_v26 = vpop.eup %248  ;;  %v114_v27 = vmul.f32 %v351_v24, %v339_v20  ;;  %252 = vrcp.f32 %v360_v30  ;;  %v105_v46 = vand.u32 2147483647, %v360_v30  ;;  %v107_v52 = vand.u32 2147483648, %v360_v30  ;;  %vm408_vm12 = vmor %vm86_vm2, %vm87_vm7  ;;  %v414_v2 = vld [vmem:[#allocation3 + $0x5] sm:$0x1] }
  0x98   :  { %v83_v28 = vsub.f32 1.0, %v82_v25  ;;  %v161_v29 = vmul.f32 %v354_v26, %v342_v21  ;;  %v365_v35 = vpop.eup %250  ;;  %254 = vrcp.f32 %v362_v33  ;;  %vm119_vm8 = vweird.f32 %v351_v24 }
  0x99   :  { %v115_v32 = vsub.f32 1.0, %v114_v27  ;;  %v193_v45 = vmul.f32 %v365_v35, %v346_v22  ;;  %256 = vrcp.f32 %v370_v38  ;;  %vm166_vm9 = vweird.f32 %v354_v26  ;;  %vm423_vm14 = vmor %vm118_vm3, %vm119_vm8  ;;  %v75_v27 = vld [vmem:[#allocation2] sm:$0x1] }
  0x9a   :  { %v84_v39 = vmul.f32 %v348_v23, %v83_v28  ;;  %v162_v40 = vsub.f32 1.0, %v161_v29  ;;  %vm101_vm10 = vweird.f32 %v360_v30  ;;  %vm402_vm11 = vcmp.eq.f32.partialorder %v105_v46, 8.507059e+37  ;;  %vm443_vm3 = vmor %vm165_vm5, %vm166_vm9 }
  0x9b   :  { %v116_v43 = vmul.f32 %v351_v24, %v115_v32  ;;  %v194_v59 = vsub.f32 1.0, %v193_v45  ;;  %v108_v0 = vor.u32 1.1754944e-38, %v107_v52  ;;  %vm133_vm13 = vweird.f32 %v362_v33 }
  0x9c   :  { %v85_v53 = vadd.f32 %v348_v23, %v84_v39  ;;  %v163_v54 = vmul.f32 %v354_v26, %v162_v40  ;;  %v137_v1 = vand.u32 2147483647, %v362_v33  ;;  %vm198_vm15 = vweird.f32 %v365_v35 }
  0x9d   :  { %v253_v47 = vpop.eup %252  ;;  %v117_v57 = vadd.f32 %v351_v24, %v116_v43  ;;  %v139_v8 = vand.u32 2147483648, %v362_v33  ;;  %v195_v12 = vmul.f32 %v365_v35, %v194_v59  ;;  %258 = vrcp.f32 %v414_v2 }
  0x9e   :  { %v255_v56 = vpop.eup %254  ;;  %v97_v58 = vmul.f32 %v253_v47, %v360_v30  ;;  %v89_v4 = vsel %vm408_vm12, %v348_v23, %v85_v53  ;;  %v164_v6 = vadd.f32 %v354_v26, %v163_v54  ;;  %vm102_vm0 = vweird.f32 %v253_v47  ;;  %v78_v30 = vld [vmem:[#allocation3] sm:$0x1]  ;;  %vm479_vm12 = vmor %vm197_vm1, %vm198_vm15 }
  0x9f   :  { %v129_v61 = vmul.f32 %v255_v56, %v362_v33  ;;  %v257_v3 = vpop.eup %256  ;;  %v121_v9 = vsel %vm423_vm14, %v351_v24, %v117_v57  ;;  %vm134_vm2 = vweird.f32 %v255_v56  ;;  %v94_v14 = vsel %vm376_vm4, %v93_v42, %v89_v4  ;;  %vm103_vm4 = vmor %vm101_vm10, %vm102_vm0 }
  0xa0   :  { %v98_v63 = vsub.f32 1.0, %v97_v58  ;;  %v176_v11 = vmul.f32 %v257_v3, %v370_v38  ;;  %vm447_vm7 = vcmp.eq.f32.partialorder %v137_v1, 8.507059e+37  ;;  %v126_v19 = vsel %vm385_vm6, %v125_v49, %v121_v9  ;;  %vm135_vm5 = vmor %vm133_vm13, %vm134_vm2 }
  0xa1   :  { %v130_v7 = vsub.f32 1.0, %v129_v61  ;;  %v140_v24 = vor.u32 1.1754944e-38, %v139_v8  ;;  %v186_v25 = vand.u32 2147483648, %v370_v38  ;;  %vm181_vm8 = vweird.f32 %v257_v3 }
  0xa2   :  { %v99_v10 = vmul.f32 %v253_v47, %v98_v63  ;;  %v177_v18 = vsub.f32 1.0, %v176_v11  ;;  %v184_v31 = vand.u32 2147483647, %v370_v38  ;;  %v95_v32 = vmul.f32 %v94_v14, %v75_v27 }
  0xa3   :  { %v131_v13 = vmul.f32 %v255_v56, %v130_v7  ;;  %v168_v34 = vsel %vm443_vm3, %v354_v26, %v164_v6  ;;  %vm180_vm6 = vweird.f32 %v370_v38  ;;  %v259_v42 = vpop.eup %258  ;;  %v127_v43 = vmul.f32 %v126_v19, %v75_v27 }
  0xa4   :  { %v100_v16 = vadd.f32 %v253_v47, %v99_v10  ;;  %v178_v29 = vmul.f32 %v257_v3, %v177_v18  ;;  %v196_v44 = vadd.f32 %v365_v35, %v195_v12  ;;  %vm182_vm9 = vmor %vm180_vm6, %vm181_vm8  ;;  %v187_v26 = vor.u32 1.1754944e-38, %v186_v25 }
  0xa5   :  { %v132_v23 = vadd.f32 %v255_v56, %v131_v13  ;;  %vm185_vm10 = vcmp.eq.f32.partialorder %v184_v31, 8.507059e+37  ;;  %v208_v48 = vmul.f32 %v259_v42, %v414_v2  ;;  %v145_v53 = vmul.f32 %v94_v14, %v339_v20  ;;  %v157_v20 = vld [vmem:[#allocation3 + $0x3] sm:$0x1] }
  0xa6   :  { %v104_v28 = vsel %vm103_vm4, %v253_v47, %v100_v16  ;;  %v179_v41 = vadd.f32 %v257_v3, %v178_v29  ;;  %v201_v57 = vand.u32 2147483647, %v346_v22  ;;  %vm213_vm13 = vweird.f32 %v259_v42 }
  0xa7   :  { %v109_v36 = vsel %vm402_vm11, %v108_v0, %v104_v28  ;;  %v136_v37 = vsel %vm135_vm5, %v255_v56, %v132_v23  ;;  %vm170_vm11 = vcmp.eq.f32.partialorder %v169_v50, 8.507059e+37  ;;  %v209_v21 = vsub.f32 1.0, %v208_v48 }
  0xa8   :  { %v110_v39 = vmul.f32 %v109_v36, %v78_v30  ;;  %v141_v40 = vsel %vm447_vm7, %v140_v24, %v136_v37  ;;  %v183_v47 = vsel %vm182_vm9, %v257_v3, %v179_v41  ;;  %v146_v52 = vmul.f32 %v109_v36, %v362_v33 }
  0xa9   :  { %v142_v45 = vmul.f32 %v141_v40, %v78_v30  ;;  %v188_v38 = vsel %vm185_vm10, %v187_v26, %v183_v47  ;;  %v173_v54 = vsel %vm170_vm11, %v395_v55, %v168_v34  ;;  %v200_v33 = vsel %vm479_vm12, %v365_v35, %v196_v44 }
  0xaa   :  { %v111_v46 = vsub.f32 %v95_v32, %v110_v39  ;;  %v218_v55 = vand.u32 2147483648, %v414_v2  ;;  %v189_v59 = vmul.f32 %v188_v38, %v157_v20  ;;  %v210_v60 = vmul.f32 %v259_v42, %v209_v21 }
  0xab   :  { %v143_v49 = vsub.f32 %v127_v43, %v142_v45  ;;  %v216_v61 = vand.u32 2147483647, %v414_v2  ;;  %v204_v63 = vor.u32 1.1754944e-38, %v203_v51  ;;  %v147_v0 = vsub.f32 %v145_v53, %v146_v52 }
  0xac   :  { %v112_v50 = vmul.f32 %v111_v46, %v111_v46  ;;  %v174_v1 = vmul.f32 %v173_v54, %v154_v62  ;;  %vm202_vm14 = vcmp.eq.f32.partialorder %v201_v57, 8.507059e+37  ;;  %v211_v3 = vadd.f32 %v259_v42, %v210_v60 }
  0xad   :  { %v144_v58 = vmul.f32 %v143_v49, %v143_v49  ;;  %vm212_vm15 = vweird.f32 %v414_v2  ;;  %v205_v35 = vsel %vm202_vm14, %v204_v63, %v200_v33  ;;  %v73_v4 = vlaneseq }
  0xae   :  { %vm214_vm0 = vmor %vm212_vm15, %vm213_vm13  ;;  %v219_v6 = vor.u32 1.1754944e-38, %v218_v55  ;;  %v190_v7 = vsub.f32 %v174_v1, %v189_v59  ;;  %vm217_vm1 = vcmp.eq.f32.partialorder %v216_v61, 8.507059e+37  ;;  %v225_v9 = vmul.f32 %v188_v38, %v414_v2 }
  0xaf   :  { %v150_v5 = vadd.f32 %v144_v58, %v112_v50  ;;  %v215_v8 = vsel %vm214_vm0, %v259_v42, %v211_v3  ;;  %v148_v10 = vmul.f32 %v147_v0, %v147_v0  ;;  %v206_v12 = vmul.f32 %v205_v35, %v154_v62 }
  0xb0   :  { %v220_v11 = vsel %vm217_vm1, %v219_v6, %v215_v8  ;;  %v224_v51 = vmul.f32 %v173_v54, %v346_v22  ;;  %v74_v15 = vshrl.u32 %v73_v4, 7  ;;  %v191_v16 = vmul.f32 %v190_v7, %v190_v7 }
  0xb1   :  { %v221_v13 = vmul.f32 %v220_v11, %v157_v20  ;;  %v151_v14 = vadd.f32 %v150_v5, %v148_v10  ;;  %vm233_vm7 = vcmask 1024  }
  0xb2   :  { %v226_v18 = vsub.f32 %v224_v51, %v225_v9  ;;  %vm149_vm2 = vcmp.eq.s32.totalorder %v74_v15, 0  ;;  %vm228_vm3 = vcmp.eq.s32.totalorder %v74_v15, 1 }
  0xb3   :  { %v222_v17 = vsub.f32 %v206_v12, %v221_v13  ;;  %v152_v23 = vperm.slane %v151_v14, 0 }
  0xb4   :  { %v227_v24 = vmul.f32 %v226_v18, %v226_v18 }
  0xb5   :  { %v223_v19 = vmul.f32 %v222_v17, %v222_v17  ;;  %v153_v28 = vsel %vm149_vm2, %v152_v23, 0.0 }
  0xb7   :  { %v229_v25 = vadd.f32 %v223_v19, %v191_v16 }
  0xb9   :  { %v230_v27 = vadd.f32 %v229_v25, %v227_v24 }
  0xbb   :  { %v231_v2 = vperm.slane %v230_v27, 0 }
  0xbd   :  { %v232_v29 = vsel %vm228_vm3, %v231_v2, %v153_v28 }
  0xbe   :  { %234 = vst.msk [vmem:[%s499_s2] sm:$0x3] %vm233_vm7, %v232_v29 }
  0xbf   :  { %239 = vsyncpa [#allocation5], 1 }
  0xc0   :  { %240 = vsyncpa [#allocation7], 1 }

</bundles_post_ra>
